<compile_context>
chip_gen: v5e
topology: v5e:2x2
jax: 0.10.0
libtpu: 0.0.40
codegen_flags: <defaults>
</compile_context>

<pallas_src>
import jax
import jax.numpy as jnp
from jax.experimental import pallas as pl
from jax.experimental.pallas import tpu as pltpu

HIDDEN = 512   # fixed by the module definition
LANE = 128     # TPU lane width
SUBLANE = 8    # TPU sublane width


def _round_up(x, m):
    return ((x + m - 1) // m) * m


# ----------------------------------------------------------------------------
# Kernel: fused 2-layer MLP on one batch tile.
# ----------------------------------------------------------------------------
def _mlp_kernel(x_ref, w1_ref, b1_ref, w2_ref, b2_ref, out_ref):
    """out = relu(x @ w1 + b1) @ w2 + b2   (action head lane-padded to 128)."""
    cdt = w1_ref.dtype                      # static compute dtype (f32 or bf16)
    x = x_ref[...]
    if x.dtype != cdt:
        x = x.astype(cdt)                   # bf16 operands when enabled

    # Layer 1: (TB, D) @ (D, H) -> f32 accum, bias add, ReLU   (MXU + VPU)
    h = jnp.dot(x, w1_ref[...], preferred_element_type=jnp.float32)
    h = jnp.maximum(h + b1_ref[...], 0.0)   # (1, H) bias broadcasts over rows
    if cdt != jnp.float32:
        h = h.astype(cdt)

    # Layer 2: (TB, H) @ (H, A_pad) -> f32 accum, bias add     (MXU + VPU)
    y = jnp.dot(h, w2_ref[...], preferred_element_type=jnp.float32)
    y = y + b2_ref[...]                     # (1, A_pad) bias broadcasts

    out_ref[...] = y.astype(out_ref.dtype)  # lane-dense (128-multiple) unmasked vst


# ----------------------------------------------------------------------------
# One-time parameter preparation (lane-pad the action head, optional bf16).
# ----------------------------------------------------------------------------
def prepare_params(w1, b1, w2, b2, *, compute_dtype=jnp.float32):
    """Pad w2/b2 to a 128-lane multiple once; optionally cast weights to bf16.

    w1: (D, 512), b1: (512,) or (1, 512)
    w2: (512, n_action), b2: (n_action,) or (1, n_action)
    """
    H, A = w2.shape
    A_pad = _round_up(max(A, LANE), LANE)

    b1 = jnp.asarray(b1, jnp.float32).reshape(1, -1)
    b2 = jnp.asarray(b2, jnp.float32).reshape(1, -1)
    if A_pad != A:
        w2p = jnp.zeros((H, A_pad), w2.dtype).at[:, :A].set(w2)
        b2p = jnp.zeros((1, A_pad), jnp.float32).at[:, :A].set(b2)
    else:
        w2p, b2p = w2, b2

    return {
        "w1": jnp.asarray(w1, compute_dtype),
        "b1": b1,                               # biases stay f32 (added to f32 accum)
        "w2": jnp.asarray(w2p, compute_dtype),
        "b2": b2p,
        "n_action": A,
    }


# ----------------------------------------------------------------------------
# Batch tiling: few, large tiles; >=2 tiles for v7x megacore when B is big.
# ----------------------------------------------------------------------------
def _choose_batch_tile(B, max_tb):
    B8 = _round_up(B, SUBLANE)
    if B8 <= max_tb:
        # Split into 2 parallel tiles once each half has real MXU work
        # (v7x: 2 TensorCores); otherwise one tile, zero grid overhead.
        num_tiles = 2 if B8 >= 2 * LANE else 1
    else:
        num_tiles = max(2, pl.cdiv(B8, max_tb))
    TB = _round_up(pl.cdiv(B8, num_tiles), SUBLANE)
    grid = pl.cdiv(B, TB)                       # trailing partial tile is masked
    return TB, grid


# ----------------------------------------------------------------------------
# Forward wrapper.
# ----------------------------------------------------------------------------
def net_forward(state, params, *, max_tb=2048, return_padded=False):
    """state: (B, D) f32; params from prepare_params; returns (B, n_action)
    (or the (B, A_pad) lane-padded slab if return_padded=True)."""
    B, D = state.shape
    w1, b1, w2, b2 = params["w1"], params["b1"], params["w2"], params["b2"]
    A = params["n_action"]
    H = w1.shape[1]
    A_pad = w2.shape[1]

    TB, grid = _choose_batch_tile(B, max_tb)

    # Explicit scoped-VMEM budget (v5e default is only 16 MiB):
    # double-buffered x/out tiles + resident weights + (TB, H) hidden scratch.
    vmem_est = 4 * (
        2 * TB * D + 2 * TB * A_pad + 2 * TB * H
        + 2 * (D * H + H + H * A_pad + A_pad)
    )
    vmem_limit = int(min(max(2 * vmem_est, 16 << 20), 60 << 20))

    flops = 2 * B * D * H + 2 * B * H * A_pad
    bytes_accessed = (
        4 * (B * D + B * A_pad + H + A_pad)
        + w1.dtype.itemsize * w1.size
        + w2.dtype.itemsize * w2.size
    )

    out_padded = pl.pallas_call(
        _mlp_kernel,
        out_shape=jax.ShapeDtypeStruct((B, A_pad), jnp.float32),
        grid_spec=pltpu.PrefetchScalarGridSpec(
            num_scalar_prefetch=0,
            grid=(grid,),
            in_specs=[
                pl.BlockSpec((TB, D), lambda i: (i, 0)),      # state tile
                pl.BlockSpec((D, H), lambda i: (0, 0)),       # w1 (VMEM-resident)
                pl.BlockSpec((1, H), lambda i: (0, 0)),       # b1
                pl.BlockSpec((H, A_pad), lambda i: (0, 0)),   # w2 (lane-padded)
                pl.BlockSpec((1, A_pad), lambda i: (0, 0)),   # b2 (lane-padded)
            ],
            out_specs=pl.BlockSpec((TB, A_pad), lambda i: (i, 0)),
        ),
        compiler_params=pltpu.CompilerParams(
            dimension_semantics=("parallel",),   # shard batch tiles over v7x's 2 TCs
            vmem_limit_bytes=vmem_limit,
        ),
        cost_estimate=pl.CostEstimate(
            flops=flops, transcendentals=0, bytes_accessed=bytes_accessed
        ),
    )(state, w1, b1, w2, b2)

    if return_padded:
        return out_padded          # (B, A_pad) slab: skip the slice copy at tiny B
    return out_padded[:, :A]       # drop lane padding only (no row padding exists)


# ----------------------------------------------------------------------------
# PyTorch-style init (weights stored (in, out), transposed vs. nn.Linear).
# ----------------------------------------------------------------------------
def init_params(key, input_dim, n_action):
    k1, k2, k3, k4 = jax.random.split(key, 4)
    bound1 = 1.0 / jnp.sqrt(input_dim)
    bound2 = 1.0 / jnp.sqrt(HIDDEN)
    w1 = jax.random.uniform(k1, (input_dim, HIDDEN), jnp.float32, -bound1, bound1)
    b1 = jax.random.uniform(k2, (1, HIDDEN), jnp.float32, -bound1, bound1)
    w2 = jax.random.uniform(k3, (HIDDEN, n_action), jnp.float32, -bound2, bound2)
    b2 = jax.random.uniform(k4, (1, n_action), jnp.float32, -bound2, bound2)
    return w1, b1, w2, b2


if __name__ == "__main__":
    # TODO(synk): RMSprop optimizer / MSELoss / device plumbing are training
    # machinery, not part of the forward pass, and are not implemented here.
    key = jax.random.PRNGKey(0)
    k_x, k_p = jax.random.split(key)

    B = 8            # batch
    INPUT_DIM = 32   # *input_dims
    N_ACTION = 8     # n_action

    state = jax.random.normal(k_x, (B, INPUT_DIM), jnp.float32)
    w1, b1, w2, b2 = init_params(k_p, INPUT_DIM, N_ACTION)

    # f32 compute path: exact match to the PyTorch math.
    params = prepare_params(w1, b1, w2, b2)
    actions = jax.block_until_ready(net_forward(state, params))
    ref = jnp.maximum(state @ w1 + b1, 0.0) @ w2 + b2
    assert actions.shape == (B, N_ACTION)
    assert jnp.allclose(actions, ref, atol=1e-4, rtol=1e-4)

    # Ragged, multi-tile batch (grid > 1, partial trailing tile, no HBM pad copy).
    B2 = 300
    state2 = jax.random.normal(jax.random.PRNGKey(1), (B2, INPUT_DIM), jnp.float32)
    actions2 = jax.block_until_ready(net_forward(state2, params))
    ref2 = jnp.maximum(state2 @ w1 + b1, 0.0) @ w2 + b2
    assert actions2.shape == (B2, N_ACTION)
    assert jnp.allclose(actions2, ref2, atol=1e-4, rtol=1e-4)

    # Optional bf16-MXU path (v5e/v6e throughput lever; f32 accumulation).
    params_bf16 = prepare_params(w1, b1, w2, b2, compute_dtype=jnp.bfloat16)
    actions3 = jax.block_until_ready(net_forward(state2, params_bf16))
    assert actions3.shape == (B2, N_ACTION)
    assert jnp.allclose(actions3, ref2, atol=5e-2, rtol=5e-2)

    print("KERNEL_OK")
</pallas_src>

<mosaic_0001>
module attributes {stable_mosaic.version = 11 : i64} {
  func.func @_mlp_kernel(%arg0: i32, %arg1: memref<8x32xf32, #tpu.memory_space<vmem>>, %arg2: memref<32x512xf32, #tpu.memory_space<vmem>>, %arg3: memref<1x512xf32, #tpu.memory_space<vmem>>, %arg4: memref<512x128xf32, #tpu.memory_space<vmem>>, %arg5: memref<1x128xf32, #tpu.memory_space<vmem>>, %arg6: memref<8x128xf32, #tpu.memory_space<vmem>>) attributes {dimension_semantics = [#tpu.dimension_semantics<parallel>], iteration_bounds = array<i64: 1>, scalar_prefetch = 0 : i64, scratch_operands = 0 : i64, tpu.core_type = #tpu.core_type<tc>, window_params = [{transform_indices = @transform_0, window_bounds = array<i64: 8, 32>}, {pipeline_mode = #tpu.pipeline_mode<synchronous>, transform_indices = @transform_1, window_bounds = array<i64: 32, 512>}, {pipeline_mode = #tpu.pipeline_mode<synchronous>, transform_indices = @transform_2, window_bounds = array<i64: 1, 512>}, {pipeline_mode = #tpu.pipeline_mode<synchronous>, transform_indices = @transform_3, window_bounds = array<i64: 512, 128>}, {pipeline_mode = #tpu.pipeline_mode<synchronous>, transform_indices = @transform_4, window_bounds = array<i64: 1, 128>}, {transform_indices = @transform_5, window_bounds = array<i64: 8, 128>}]} {
    %c0 = arith.constant 0 : index
    %c0_0 = arith.constant 0 : index
    %0 = vector.load %arg1[%c0, %c0_0] : memref<8x32xf32, #tpu.memory_space<vmem>>, vector<8x32xf32>
    %c0_1 = arith.constant 0 : index
    %c0_2 = arith.constant 0 : index
    %1 = vector.load %arg2[%c0_1, %c0_2] : memref<32x512xf32, #tpu.memory_space<vmem>>, vector<32x512xf32>
    %cst = arith.constant dense<0.000000e+00> : vector<8x512xf32>
    %2 = tpu.matmul %0, %1, %cst {dimension_numbers = #tpu.dot_dimension_numbers<[1], [0], [0], [1], [0, 0, 1, 1], [], []>} : vector<8x32xf32>, vector<32x512xf32>, vector<8x512xf32> -> vector<8x512xf32>
    %c0_3 = arith.constant 0 : index
    %c0_4 = arith.constant 0 : index
    %3 = vector.load %arg3[%c0_3, %c0_4] : memref<1x512xf32, #tpu.memory_space<vmem>>, vector<1x512xf32>
    %4 = vector.broadcast %3 : vector<1x512xf32> to vector<8x512xf32>
    %5 = arith.addf %2, %4 : vector<8x512xf32>
    %cst_5 = arith.constant 0.000000e+00 : f32
    %6 = vector.broadcast %cst_5 : f32 to vector<8x512xf32>
    %7 = arith.maximumf %5, %6 : vector<8x512xf32>
    %c0_6 = arith.constant 0 : index
    %c0_7 = arith.constant 0 : index
    %8 = vector.load %arg4[%c0_6, %c0_7] : memref<512x128xf32, #tpu.memory_space<vmem>>, vector<512x128xf32>
    %cst_8 = arith.constant dense<0.000000e+00> : vector<8x128xf32>
    %9 = tpu.matmul %7, %8, %cst_8 {dimension_numbers = #tpu.dot_dimension_numbers<[1], [0], [0], [1], [0, 0, 1, 1], [], []>} : vector<8x512xf32>, vector<512x128xf32>, vector<8x128xf32> -> vector<8x128xf32>
    %c0_9 = arith.constant 0 : index
    %c0_10 = arith.constant 0 : index
    %10 = vector.load %arg5[%c0_9, %c0_10] : memref<1x128xf32, #tpu.memory_space<vmem>>, vector<1x128xf32>
    %11 = vector.broadcast %10 : vector<1x128xf32> to vector<8x128xf32>
    %12 = arith.addf %9, %11 : vector<8x128xf32>
    %c0_11 = arith.constant 0 : index
    %c0_12 = arith.constant 0 : index
    %13 = vector.load %arg6[%c0_11, %c0_12] : memref<8x128xf32, #tpu.memory_space<vmem>>, vector<8x128xf32>
    tpu.vector_store %arg6[%c0_11, %c0_12], %12 {strides = array<i32>} : memref<8x128xf32, #tpu.memory_space<vmem>>, vector<8x128xf32>,
    return
  }
  func.func @transform_0(%arg0: i32) -> (i32, i32) {
    %c0_i32 = arith.constant 0 : i32
    %c0_i32_0 = arith.constant 0 : i32
    return %arg0, %c0_i32 : i32, i32
  }
  func.func @transform_1(%arg0: i32) -> (i32, i32) {
    %c0_i32 = arith.constant 0 : i32
    %c0_i32_0 = arith.constant 0 : i32
    %c0_i32_1 = arith.constant 0 : i32
    return %c0_i32, %c0_i32_0 : i32, i32
  }
  func.func @transform_2(%arg0: i32) -> (i32, i32) {
    %c0_i32 = arith.constant 0 : i32
    %c0_i32_0 = arith.constant 0 : i32
    %c0_i32_1 = arith.constant 0 : i32
    return %c0_i32, %c0_i32_0 : i32, i32
  }
  func.func @transform_3(%arg0: i32) -> (i32, i32) {
    %c0_i32 = arith.constant 0 : i32
    %c0_i32_0 = arith.constant 0 : i32
    %c0_i32_1 = arith.constant 0 : i32
    return %c0_i32, %c0_i32_0 : i32, i32
  }
  func.func @transform_4(%arg0: i32) -> (i32, i32) {
    %c0_i32 = arith.constant 0 : i32
    %c0_i32_0 = arith.constant 0 : i32
    %c0_i32_1 = arith.constant 0 : i32
    return %c0_i32, %c0_i32_0 : i32, i32
  }
  func.func @transform_5(%arg0: i32) -> (i32, i32) {
    %c0_i32 = arith.constant 0 : i32
    %c0_i32_0 = arith.constant 0 : i32
    return %arg0, %c0_i32 : i32, i32
  }
}

</mosaic_0001>

<bundles_post_ra>
// kernel: tpu_custom_call.1
= control target key start
LH: loop header
LB: loop body
LE: loop exit
PB: predicated region body
PF: predicated region fallthrough
CT: control target
= control target key end

     0   :  { %10 = vsyncpa [#allocation3], 0  ;;  %s566_s0 = inlined_call_operand.hbm [shape: f32[8,32], index: 0, kind: input, shape index: {}]   ;;  %s567_s1 = inlined_call_operand.hbm [shape: f32[32,512], index: 1, kind: input, shape index: {}]   ;;  %s568_s2 = inlined_call_operand.hbm [shape: f32[1,512], index: 2, kind: input, shape index: {}]   ;;  %s569_s3 = inlined_call_operand.hbm [shape: f32[512,128], index: 3, kind: input, shape index: {}]   ;;  %s570_s4 = inlined_call_operand.vmem [shape: f32[1,128], index: 4, kind: input, shape index: {}]   ;;  %s571_s5 = inlined_call_operand.hbm [shape: f32[8,128], index: 5, kind: output, shape index: {}]  }
   0x1   :  { %11 = vsyncpa [#allocation6], 0 }
   0x2   :  { %12 = vsyncpa [#allocation9], 0  ;;  %s29_s20 = sshll.u32 %s567_s1, 4  ;;  %s30_s20 = int_to_ptr.hbm [resolvable:$true] %s29_s20 }
   0x3   :  { %13 = vsyncpa [#allocation4], 0  ;;  %s505_s21 = smov [#allocation5]   ;;  %s19_s25 = sshll.u32 %s566_s0, 4  ;;  %s20_s25 = int_to_ptr.hbm [resolvable:$true] %s19_s25 }
   0x4   :  { %s31_s22 = sshll.u32 %s505_s21, 4  ;;  %s506_s26 = smov 512   ;;  %s32_s22 = int_to_ptr.vmem [resolvable:$true] %s31_s22 }
   0x5   :  { %s507_s27 = smov 32   ;;  %s508_s28 = smov [#allocation2]  }
   0x6   :  { %37 = dma.hbm_to_vmem [thread:$0]  %s30_s20, 2048, %s32_s22, [#allocation6], %s506_s26, %s506_s26, %s507_s27  }
   0x7   :  { %s21_s29 = sshll.u32 %s508_s28, 4  ;;  %s43_s7 = sshll.u32 %s568_s2, 4  ;;  %s22_s29 = int_to_ptr.vmem [resolvable:$true] %s21_s29  ;;  %s44_s7 = int_to_ptr.hbm [resolvable:$true] %s43_s7 }
   0x8   :  { %24 = dma.hbm_to_vmem [thread:$0]  %s20_s25, 128, %s22_s29, [#allocation3]  }
   0x9   :  { %s53_s9 = sshll.u32 %s569_s3, 4  ;;  %s509_s10 = smov [#allocation7]   ;;  %s54_s9 = int_to_ptr.hbm [resolvable:$true] %s53_s9 }
   0xa   :  { %s45_s11 = sshll.u32 %s509_s10, 4  ;;  %s510_s0 = smov [#allocation8]   ;;  %s46_s11 = int_to_ptr.vmem [resolvable:$true] %s45_s11 }
   0xb   :  { %48 = dma.hbm_to_vmem [thread:$0]  %s44_s7, 64, %s46_s11, [#allocation6]  }
   0xc   :  { %s55_s12 = sshll.u32 %s510_s0, 4  ;;  %s511_s13 = smov 128   ;;  %s56_s12 = int_to_ptr.vmem [resolvable:$true] %s55_s12 }
   0xd   :  { %s512_s14 = smov 8  }
   0xe   :  { %61 = dma.hbm_to_vmem [thread:$0]  %s54_s9, 8192, %s56_s12, [#allocation9], %s511_s13, %s511_s13, %s512_s14  }
   0xf   :  { %497 = dma.done.wait [#allocation3], 128  }
  0x10   :  { %498 = vsyncadd [#allocation3], 4294967168 }
  0x11   :  { %499 = dma.done.wait [#allocation6], 2112  }
  0x12   :  { %500 = vsyncadd [#allocation6], 4294965184 }
  0x13   :  { %501 = dma.done.wait [#allocation9], 8192  }
  0x14   :  { %502 = vsyncadd [#allocation9], 4294959104  ;;  %v95_v0 = vld [vmem:[#allocation5 + $0x70] sm:$0xff]  ;;  %v96_v2 = vld [vmem:[#allocation5 + $0x78] sm:$0xff]  ;;  %vm107_vm0 = vcmask 261120   ;;  %s513_s15 = smov [#allocation10]  }
  0x15   :  { %v91_v1 = vld [vmem:[#allocation5 + $0x50] sm:$0xff]  ;;  %163 = vmatpush.msra.mxu2 %v95_v0  ;;  %183 = vmatpush.msra.mxu3 %v96_v2  ;;  %v92_v3 = vld [vmem:[#allocation5 + $0x58] sm:$0xff]  ;;  %v93_v6 = vld [vmem:[#allocation5 + $0x60] sm:$0xff]  ;;  %s349_s16 = sshll.u32 %s513_s15, 4  ;;  %s351_s19 = sshll.u32 %s571_s5, 4  ;;  %s350_s16 = int_to_ptr.vmem [resolvable:$true] %s349_s16  ;;  %s352_s19 = int_to_ptr.hbm [resolvable:$true] %s351_s19 }
  0x16   :  { %v87_v4 = vld [vmem:[#allocation5 + $0x30] sm:$0xff]  ;;  %v88_v5 = vld [vmem:[#allocation5 + $0x38] sm:$0xff]  ;;  %v89_v7 = vld [vmem:[#allocation5 + $0x40] sm:$0xff]  ;;  %123 = vmatpush.msra.mxu0 %v93_v6 }
  0x17   :  { %164 = vmatpush.msra.mxu2 %v91_v1  ;;  %184 = vmatpush.msra.mxu3 %v92_v3  ;;  %v94_v8 = vld [vmem:[#allocation5 + $0x68] sm:$0xff]  ;;  %v83_v9 = vld [vmem:[#allocation5 + $0x10] sm:$0xff]  ;;  %v84_v10 = vld [vmem:[#allocation5 + $0x18] sm:$0xff] }
  0x18   :  { %143 = vmatpush.msra.mxu1 %v94_v8  ;;  %v90_v11 = vld [vmem:[#allocation5 + $0x48] sm:$0xff]  ;;  %v80_v12 = vld [vmem:[#allocation2] sm:$0xff]  ;;  %124 = vmatpush.msra.mxu0 %v89_v7  ;;  %v85_v13 = vld [vmem:[#allocation5 + $0x20] sm:$0xff] }
  0x19   :  { %165 = vmatpush.msra.mxu2 %v87_v4  ;;  %185 = vmatpush.msra.mxu3 %v88_v5  ;;  %v86_v14 = vld [vmem:[#allocation5 + $0x28] sm:$0xff]  ;;  %v242_v15 = vld [vmem:[#allocation8 + $0x178] sm:$0xff]  ;;  %v241_v20 = vld [vmem:[#allocation8 + $0x170] sm:$0xff] }
  0x1a   :  { %144 = vmatpush.msra.mxu1 %v90_v11  ;;  %v258_v16 = vld [vmem:[#allocation8 + $0x1f8] sm:$0xff]  ;;  %v82_v18 = vld [vmem:[#allocation5 + $0x8] sm:$0xff]  ;;  %125 = vmatpush.msra.mxu0 %v85_v13  ;;  %v257_v22 = vld [vmem:[#allocation8 + $0x1f0] sm:$0xff] }
  0x1b   :  { %166 = vmatpush.msra.mxu2 %v83_v9  ;;  %186 = vmatpush.msra.mxu3 %v84_v10  ;;  %v81_v17 = vld [vmem:[#allocation5] sm:$0xff]  ;;  %v209_v23 = vld [vmem:[#allocation8 + $0x70] sm:$0xff]  ;;  %v240_v24 = vld [vmem:[#allocation8 + $0x168] sm:$0xff] }
  0x1c   :  { %365 = vmatmul.msk.f32.vlgmr.msra.gmra.mxu2 %vm107_vm0, %v80_v12  ;;  %366 = vmatmul.msk.f32.vlgmr.msra.gmra.mxu3 %vm107_vm0, %v80_v12  ;;  %v210_v19 = vld [vmem:[#allocation8 + $0x78] sm:$0xff]  ;;  %v225_v25 = vld [vmem:[#allocation8 + $0xf0] sm:$0xff]  ;;  %v256_v26 = vld [vmem:[#allocation8 + $0x1e8] sm:$0xff] }
  0x1d   :  { %145 = vmatpush.msra.mxu1 %v86_v14  ;;  %303 = vmatpush.msrb.mxu2 %v242_v15  ;;  %v226_v21 = vld [vmem:[#allocation8 + $0xf8] sm:$0xff]  ;;  %v208_v27 = vld [vmem:[#allocation8 + $0x68] sm:$0xff]  ;;  %v239_v28 = vld [vmem:[#allocation8 + $0x160] sm:$0xff] }
  0x1e   :  { %323 = vmatpush.msrb.mxu3 %v258_v16  ;;  %126 = vmatpush.msra.mxu0 %v81_v17  ;;  %v224_v29 = vld [vmem:[#allocation8 + $0xe8] sm:$0xff]  ;;  %v255_v30 = vld [vmem:[#allocation8 + $0x1e0] sm:$0xff]  ;;  %v238_v32 = vld [vmem:[#allocation8 + $0x158] sm:$0xff] }
  0x1f   :  { %146 = vmatpush.msra.mxu1 %v82_v18  ;;  %363 = vmatmul.msk.f32.vlgmr.msra.gmra.mxu0 %vm107_vm0, %v80_v12  ;;  %v207_v31 = vld [vmem:[#allocation8 + $0x60] sm:$0xff]  ;;  %v254_v34 = vld [vmem:[#allocation8 + $0x1d8] sm:$0xff]  ;;  %v237_v36 = vld [vmem:[#allocation8 + $0x150] sm:$0xff] }
  0x20   :  { %364 = vmatmul.msk.f32.vlgmr.msra.gmra.mxu1 %vm107_vm0, %v80_v12  ;;  %263 = vmatpush.msrb.mxu0 %v210_v19  ;;  %v223_v33 = vld [vmem:[#allocation8 + $0xe0] sm:$0xff]  ;;  %v206_v35 = vld [vmem:[#allocation8 + $0x58] sm:$0xff]  ;;  %v253_v38 = vld [vmem:[#allocation8 + $0x1d0] sm:$0xff] }
  0x21   :  { %304 = vmatpush.msrb.mxu2 %v241_v20  ;;  %283 = vmatpush.msrb.mxu1 %v226_v21  ;;  %v222_v37 = vld [vmem:[#allocation8 + $0xd8] sm:$0xff]  ;;  %v205_v39 = vld [vmem:[#allocation8 + $0x50] sm:$0xff]  ;;  %v236_v40 = vld [vmem:[#allocation8 + $0x148] sm:$0xff] }
  0x22   :  { %324 = vmatpush.msrb.mxu3 %v257_v22  ;;  %264 = vmatpush.msrb.mxu0 %v209_v23  ;;  %v221_v41 = vld [vmem:[#allocation8 + $0xd0] sm:$0xff]  ;;  %v252_v42 = vld [vmem:[#allocation8 + $0x1c8] sm:$0xff]  ;;  %v235_v44 = vld [vmem:[#allocation8 + $0x140] sm:$0xff] }
  0x23   :  { %305 = vmatpush.msrb.mxu2 %v240_v24  ;;  %284 = vmatpush.msrb.mxu1 %v225_v25  ;;  %v204_v43 = vld [vmem:[#allocation8 + $0x48] sm:$0xff]  ;;  %v251_v46 = vld [vmem:[#allocation8 + $0x1c0] sm:$0xff]  ;;  %v234_v48 = vld [vmem:[#allocation8 + $0x138] sm:$0xff] }
  0x24   :  { %325 = vmatpush.msrb.mxu3 %v256_v26  ;;  %265 = vmatpush.msrb.mxu0 %v208_v27  ;;  %v220_v45 = vld [vmem:[#allocation8 + $0xc8] sm:$0xff]  ;;  %v203_v47 = vld [vmem:[#allocation8 + $0x40] sm:$0xff]  ;;  %v250_v50 = vld [vmem:[#allocation8 + $0x1b8] sm:$0xff] }
  0x25   :  { %306 = vmatpush.msrb.mxu2 %v239_v28  ;;  %285 = vmatpush.msrb.mxu1 %v224_v29  ;;  %v219_v49 = vld [vmem:[#allocation8 + $0xc0] sm:$0xff]  ;;  %v202_v51 = vld [vmem:[#allocation8 + $0x38] sm:$0xff]  ;;  %v233_v52 = vld [vmem:[#allocation8 + $0x130] sm:$0xff] }
  0x26   :  { %326 = vmatpush.msrb.mxu3 %v255_v30  ;;  %266 = vmatpush.msrb.mxu0 %v207_v31  ;;  %v218_v53 = vld [vmem:[#allocation8 + $0xb8] sm:$0xff]  ;;  %v249_v54 = vld [vmem:[#allocation8 + $0x1b0] sm:$0xff]  ;;  %v232_v56 = vld [vmem:[#allocation8 + $0x128] sm:$0xff] }
  0x27   :  { %307 = vmatpush.msrb.mxu2 %v238_v32  ;;  %286 = vmatpush.msrb.mxu1 %v223_v33  ;;  %v201_v55 = vld [vmem:[#allocation8 + $0x30] sm:$0xff]  ;;  %v248_v58 = vld [vmem:[#allocation8 + $0x1a8] sm:$0xff]  ;;  %v231_v60 = vld [vmem:[#allocation8 + $0x120] sm:$0xff] }
  0x28   :  { %327 = vmatpush.msrb.mxu3 %v254_v34  ;;  %267 = vmatpush.msrb.mxu0 %v206_v35  ;;  %v217_v57 = vld [vmem:[#allocation8 + $0xb0] sm:$0xff]  ;;  %v200_v59 = vld [vmem:[#allocation8 + $0x28] sm:$0xff]  ;;  %v247_v62 = vld [vmem:[#allocation8 + $0x1a0] sm:$0xff] }
  0x29   :  { %308 = vmatpush.msrb.mxu2 %v237_v36  ;;  %287 = vmatpush.msrb.mxu1 %v222_v37  ;;  %v216_v61 = vld [vmem:[#allocation8 + $0xa8] sm:$0xff]  ;;  %v199_v63 = vld [vmem:[#allocation8 + $0x20] sm:$0xff]  ;;  %v230_v0 = vld [vmem:[#allocation8 + $0x118] sm:$0xff] }
  0x2a   :  { %328 = vmatpush.msrb.mxu3 %v253_v38  ;;  %268 = vmatpush.msrb.mxu0 %v205_v39  ;;  %v198_v1 = vld [vmem:[#allocation8 + $0x18] sm:$0xff]  ;;  %v215_v2 = vld [vmem:[#allocation8 + $0xa0] sm:$0xff]  ;;  %v229_v3 = vld [vmem:[#allocation8 + $0x110] sm:$0xff] }
  0x2b   :  { %309 = vmatpush.msrb.mxu2 %v236_v40  ;;  %288 = vmatpush.msrb.mxu1 %v221_v41  ;;  %v246_v4 = vld [vmem:[#allocation8 + $0x198] sm:$0xff]  ;;  %v197_v5 = vld [vmem:[#allocation8 + $0x10] sm:$0xff]  ;;  %v228_v7 = vld [vmem:[#allocation8 + $0x108] sm:$0xff] }
  0x2c   :  { %329 = vmatpush.msrb.mxu3 %v252_v42  ;;  %269 = vmatpush.msrb.mxu0 %v204_v43  ;;  %v214_v6 = vld [vmem:[#allocation8 + $0x98] sm:$0xff]  ;;  %v245_v8 = vld [vmem:[#allocation8 + $0x190] sm:$0xff]  ;;  %v196_v9 = vld [vmem:[#allocation8 + $0x8] sm:$0xff] }
  0x2d   :  { %310 = vmatpush.msrb.mxu2 %v235_v44  ;;  %289 = vmatpush.msrb.mxu1 %v220_v45  ;;  %v213_v10 = vld [vmem:[#allocation8 + $0x90] sm:$0xff]  ;;  %v227_v11 = vld [vmem:[#allocation8 + $0x100] sm:$0xff]  ;;  %v244_v12 = vld [vmem:[#allocation8 + $0x188] sm:$0xff] }
  0x2e   :  { %330 = vmatpush.msrb.mxu3 %v251_v46  ;;  %270 = vmatpush.msrb.mxu0 %v203_v47  ;;  %v195_v13 = vld [vmem:[#allocation8] sm:$0xff]  ;;  %v212_v14 = vld [vmem:[#allocation8 + $0x88] sm:$0xff]  ;;  %v97_v17 = vld [vmem:[#allocation7] sm:$0xf] }
  0x2f   :  { %311 = vmatpush.msrb.mxu2 %v234_v48  ;;  %290 = vmatpush.msrb.mxu1 %v219_v49  ;;  %v243_v15 = vld [vmem:[#allocation8 + $0x180] sm:$0xff]  ;;  %v99_v18 = vperm.slane %v97_v17, 0  ;;  %v100_v19 = vperm.slane %v97_v17, 1  ;;  %v101_v20 = vperm.slane %v97_v17, 2  ;;  %v102_v21 = vperm.slane %v97_v17, 3 }
  0x30   :  { %331 = vmatpush.msrb.mxu3 %v250_v50  ;;  %271 = vmatpush.msrb.mxu0 %v202_v51  ;;  %v211_v16 = vld [vmem:[#allocation8 + $0x80] sm:$0xff]  ;;  %v376_v34 = vld [vmem:[%s570_s4] ss:$0 sm:$0xff] }
  0x31   :  { %312 = vmatpush.msrb.mxu2 %v233_v52  ;;  %291 = vmatpush.msrb.mxu1 %v218_v53 }
  0x32   :  { %332 = vmatpush.msrb.mxu3 %v249_v54  ;;  %272 = vmatpush.msrb.mxu0 %v201_v55 }
  0x33   :  { %313 = vmatpush.msrb.mxu2 %v232_v56  ;;  %292 = vmatpush.msrb.mxu1 %v217_v57 }
  0x34   :  { %333 = vmatpush.msrb.mxu3 %v248_v58  ;;  %273 = vmatpush.msrb.mxu0 %v200_v59 }
  0x35   :  { %314 = vmatpush.msrb.mxu2 %v231_v60  ;;  %293 = vmatpush.msrb.mxu1 %v216_v61 }
  0x36   :  { %334 = vmatpush.msrb.mxu3 %v247_v62  ;;  %274 = vmatpush.msrb.mxu0 %v199_v63 }
  0x37   :  { %315 = vmatpush.msrb.mxu2 %v230_v0  ;;  %294 = vmatpush.msrb.mxu1 %v215_v2 }
  0x38   :  { %275 = vmatpush.msrb.mxu0 %v198_v1  ;;  %335 = vmatpush.msrb.mxu3 %v246_v4 }
  0x39   :  { %316 = vmatpush.msrb.mxu2 %v229_v3  ;;  %295 = vmatpush.msrb.mxu1 %v214_v6 }
  0x3a   :  { %276 = vmatpush.msrb.mxu0 %v197_v5  ;;  %336 = vmatpush.msrb.mxu3 %v245_v8 }
  0x3b   :  { %317 = vmatpush.msrb.mxu2 %v228_v7  ;;  %296 = vmatpush.msrb.mxu1 %v213_v10 }
  0x3c   :  { %277 = vmatpush.msrb.mxu0 %v196_v9  ;;  %337 = vmatpush.msrb.mxu3 %v244_v12 }
  0x3d   :  { %318 = vmatpush.msrb.mxu2 %v227_v11  ;;  %297 = vmatpush.msrb.mxu1 %v212_v14 }
  0x3e   :  { %278 = vmatpush.msrb.mxu0 %v195_v13  ;;  %338 = vmatpush.msrb.mxu3 %v243_v15 }
  0x3f   :  { %298 = vmatpush.msrb.mxu1 %v211_v16 }
  0x9c   :  { %v128_v22 = vpop.f32.mrf.mxu0 }
  0x9d   :  { %v148_v23 = vpop.f32.mrf.mxu1  ;;  %v129_v24 = vadd.f32 %v128_v22, %v99_v18 }
  0x9e   :  { %v149_v25 = vadd.f32 %v148_v23, %v100_v19 }
  0x9f   :  { %v168_v26 = vpop.f32.mrf.mxu2  ;;  %v188_v27 = vpop.f32.mrf.mxu3  ;;  %v191_v29 = vmax.f32 %v129_v24, 0.0 }
  0xa0   :  { %v169_v28 = vadd.f32 %v168_v26, %v101_v20  ;;  %v189_v30 = vadd.f32 %v188_v27, %v102_v21  ;;  %v192_v31 = vmax.f32 %v149_v25, 0.0 }
  0xa1   :  { %279 = vmatmul.f32.vlgmr.msrb.gmra.mxu0 %v191_v29 }
  0xa2   :  { %v193_v32 = vmax.f32 %v169_v28, 0.0  ;;  %v194_v33 = vmax.f32 %v189_v30, 0.0  ;;  %299 = vmatmul.f32.vlgmr.msrb.gmra.mxu1 %v192_v31 }
  0xa4   :  { %319 = vmatmul.f32.vlgmr.msrb.gmra.mxu2 %v193_v32  ;;  %339 = vmatmul.f32.vlgmr.msrb.gmra.mxu3 %v194_v33 }
 0x11e   :  { %v280_v35 = vpop.f32.mrf.mxu0 }
 0x11f   :  { %v281_v36 = vadd.f32 %v376_v34, %v280_v35  ;;  %v300_v37 = vpop.f32.mrf.mxu1 }
 0x121   :  { %v301_v38 = vadd.f32 %v300_v37, %v281_v36 }
 0x127   :  { %v320_v39 = vpop.f32.mrf.mxu2  ;;  %v340_v40 = vpop.f32.mrf.mxu3 }
 0x128   :  { %v321_v41 = vadd.f32 %v320_v39, %v301_v38 }
 0x12a   :  { %v341_v42 = vadd.f32 %v340_v40, %v321_v41 }
 0x12c   :  { %343 = vst [vmem:[#allocation10] sm:$0xff] %v341_v42 }
 0x12d   :  { %354 = dma.vmem_to_hbm [thread:$0]  %s350_s16, 128, %s352_s19, [#allocation4]  }
 0x12e   :  { %503 = dma.done.wait [#allocation4], 128  }
 0x12f   :  { %504 = vsyncadd [#allocation4], 4294967168 }
 0x130   :  { %359 = vsyncpa [#allocation3], 1 }
 0x131   :  { %360 = vsyncpa [#allocation6], 1 }
 0x132   :  { %361 = vsyncpa [#allocation9], 1 }
 0x133   :  { %362 = vsyncpa [#allocation4], 1 }

</bundles_post_ra>
